<compile_context>
chip_gen: v5e
topology: v5e:2x2
jax: 0.10.0
libtpu: 0.0.40
codegen_flags: <defaults>
</compile_context>

<pallas_src>
import functools

import jax
import jax.numpy as jnp
from jax.experimental import pallas as pl
from jax.experimental.pallas import tpu as pltpu

Z_DIM = 64
H1 = 256
H2 = 128
IMG_DIM = 784          # 28 * 28 (classic basicGAN MNIST generator output)
LEAKY_SLOPE = 0.1      # matches nn.LeakyReLU(0.1)


def _round_up(x, m):
    return ((x + m - 1) // m) * m


def _leaky_relu(x, slope=LEAKY_SLOPE):
    return jnp.where(x > 0, x, slope * x)


def generator_kernel(x_ref, w1_ref, b1_ref, w2_ref, b2_ref, w3_ref, b3_ref,
                     o_ref):
    """One batch tile of the fused 3-layer MLP. Weights resident in VMEM."""
    cdt = w1_ref.dtype                  # compute dtype (bf16 or f32)
    x = x_ref[...].astype(cdt)          # in-kernel cast; x DMA stays 64 lanes

    # Layer 1: Linear(z -> 256) + LeakyReLU(0.1). f32 accumulation; the
    # epilogue stays f32 (v5e VPU has no bf16), cast back for the next matmul.
    h = jnp.dot(x, w1_ref[...], preferred_element_type=jnp.float32)
    h = _leaky_relu(h + b1_ref[...]).astype(cdt)

    # Layer 2: Linear(256 -> 128) + LeakyReLU(0.1)
    h = jnp.dot(h, w2_ref[...], preferred_element_type=jnp.float32)
    h = _leaky_relu(h + b2_ref[...]).astype(cdt)

    # Layer 3: Linear(128 -> img_dim) + Tanh; direct (bb, 784) store.
    h = jnp.dot(h, w3_ref[...], preferred_element_type=jnp.float32)
    o_ref[...] = jnp.tanh(h + b3_ref[...]).astype(o_ref.dtype)


def prepare_params(w1, b1, w2, b2, w3, b3, compute_dtype=jnp.bfloat16):
    """One-time weight prep (hoisted out of the forward): cast weights to the
    MXU compute dtype, keep biases f32 (they add into the f32 accumulator)."""
    def prep_b(b):
        return jnp.asarray(b).reshape(1, -1).astype(jnp.float32)
    return (w1.astype(compute_dtype), prep_b(b1),
            w2.astype(compute_dtype), prep_b(b2),
            w3.astype(compute_dtype), prep_b(b3))


def _pick_block_b(B, block_b, sublane):
    # Ensure >= 2 grid steps whenever the batch allows it, so the "parallel"
    # axis can shard across v7x's two TensorCores (no effect on v5e/v6e).
    bb = min(block_b, _round_up(pl.cdiv(B, 2), sublane))
    return max(bb, sublane)


@functools.partial(jax.jit, static_argnames=("block_b", "out_dtype"))
def generator_forward(x, w1, b1, w2, b2, w3, b3, *, block_b=512,
                      out_dtype=None):
    """y = tanh(leaky(leaky(x@w1+b1)@w2+b2)@w3+b3).

    Expects params from `prepare_params` (weights pre-cast, biases f32,
    shape (1, out)).  Output dtype defaults to the weight compute dtype
    (bf16 by default) to halve the dominant HBM writeback.
    """
    B, z = x.shape
    h1 = w1.shape[1]
    h2 = w2.shape[1]
    img_dim = w3.shape[1]
    compute_dtype = w1.dtype
    out_dtype = compute_dtype if out_dtype is None else out_dtype

    # Batch tile: big enough to feed the MXU / amortize the ~0.35us per-step
    # overhead; 16-sublane quantum for bf16 packing, 8 for f32.  Callers with
    # very large B on v6e can raise block_b to 1024 (still tiny in VMEM).
    sublane = 16 if compute_dtype == jnp.bfloat16 else 8
    bb = _pick_block_b(B, block_b, sublane)
    grid = (pl.cdiv(B, bb),)

    # Grid-invariant (resident) weight/bias blocks.
    const_spec = lambda shape: pl.BlockSpec(shape, lambda i: (0, 0))

    out = pl.pallas_call(
        generator_kernel,
        out_shape=jax.ShapeDtypeStruct((B, img_dim), out_dtype),
        grid_spec=pltpu.PrefetchScalarGridSpec(
            num_scalar_prefetch=0,
            grid=grid,
            in_specs=[
                # x: batch-tiled; last dim 64 == full array dim (legal, no pad)
                pl.BlockSpec((bb, z), lambda i: (i, 0)),
                const_spec((z, h1)),        # w1
                const_spec((1, h1)),        # b1
                const_spec((h1, h2)),       # w2
                const_spec((1, h2)),        # b2
                const_spec((h2, img_dim)),  # w3 (last dim == full dim)
                const_spec((1, img_dim)),   # b3
            ],
            # Direct (bb, 784) output block: no pad columns, no wrapper slice.
            out_specs=pl.BlockSpec((bb, img_dim), lambda i: (i, 0)),
        ),
        compiler_params=pltpu.CompilerParams(
            dimension_semantics=("parallel",)),  # megacore-shardable on v7x
    )(x, w1, b1, w2, b2, w3, b3)
    return out


def init_params(key, z_dim=Z_DIM, img_dim=IMG_DIM):
    """PyTorch nn.Linear-style init: U[-1/sqrt(fan_in), 1/sqrt(fan_in)]."""
    def linear(key, fan_in, fan_out):
        kw, kb = jax.random.split(key)
        bound = 1.0 / jnp.sqrt(fan_in)
        w = jax.random.uniform(kw, (fan_in, fan_out), jnp.float32, -bound, bound)
        b = jax.random.uniform(kb, (1, fan_out), jnp.float32, -bound, bound)
        return w, b

    k1, k2, k3 = jax.random.split(key, 3)
    w1, b1 = linear(k1, z_dim, H1)
    w2, b2 = linear(k2, H1, H2)
    w3, b3 = linear(k3, H2, img_dim)
    return w1, b1, w2, b2, w3, b3


def reference_forward(x, w1, b1, w2, b2, w3, b3):
    h = _leaky_relu(x @ w1 + b1)
    h = _leaky_relu(h @ w2 + b2)
    return jnp.tanh(h @ w3 + b3)


if __name__ == "__main__":
    key = jax.random.PRNGKey(0)
    k_params, k_x1, k_x2 = jax.random.split(key, 3)

    params = init_params(k_params)

    # One-time weight prep (hoisted out of the per-call path).
    params_bf16 = prepare_params(*params, compute_dtype=jnp.bfloat16)
    params_f32 = prepare_params(*params, compute_dtype=jnp.float32)

    # Small demo batch (multiple of 16 -> full tiles on the bf16 path).
    x_small = jax.random.normal(k_x1, (16, Z_DIM), jnp.float32)
    ref_small = reference_forward(x_small, *params)

    # Exact path: f32 MXU inputs + f32 output, tight tolerance vs reference.
    out_f32 = jax.block_until_ready(
        generator_forward(x_small, *params_f32, out_dtype=jnp.float32))
    assert out_f32.shape == (16, IMG_DIM), out_f32.shape
    assert out_f32.dtype == jnp.float32
    assert jnp.allclose(out_f32, ref_small, atol=1e-5, rtol=1e-5), \
        float(jnp.max(jnp.abs(out_f32 - ref_small)))

    # Default fast path: bf16 MXU inputs, f32 accumulation, bf16 output.
    out_bf16 = jax.block_until_ready(generator_forward(x_small, *params_bf16))
    assert out_bf16.shape == (16, IMG_DIM), out_bf16.shape
    assert out_bf16.dtype == jnp.bfloat16
    assert jnp.allclose(out_bf16.astype(jnp.float32), ref_small,
                        atol=5e-2, rtol=5e-2), \
        float(jnp.max(jnp.abs(out_bf16.astype(jnp.float32) - ref_small)))

    # Larger batch: default block_b, the occupancy rule splits B=256 into two
    # 128-row tiles (grid=2) so both v7x TensorCores get work.
    x_big = jax.random.normal(k_x2, (256, Z_DIM), jnp.float32)
    ref_big = reference_forward(x_big, *params)
    out_big = jax.block_until_ready(generator_forward(x_big, *params_bf16))
    assert out_big.shape == (256, IMG_DIM), out_big.shape
    assert jnp.allclose(out_big.astype(jnp.float32), ref_big,
                        atol=5e-2, rtol=5e-2), \
        float(jnp.max(jnp.abs(out_big.astype(jnp.float32) - ref_big)))

    print("KERNEL_OK")
</pallas_src>

<mosaic_0001>
module attributes {stable_mosaic.version = 11 : i64} {
  func.func @generator_kernel(%arg0: i32, %arg1: memref<8x64xf32, #tpu.memory_space<vmem>>, %arg2: memref<64x256xf32, #tpu.memory_space<vmem>>, %arg3: memref<1x256xf32, #tpu.memory_space<vmem>>, %arg4: memref<256x128xf32, #tpu.memory_space<vmem>>, %arg5: memref<1x128xf32, #tpu.memory_space<vmem>>, %arg6: memref<128x784xf32, #tpu.memory_space<vmem>>, %arg7: memref<1x784xf32, #tpu.memory_space<vmem>>, %arg8: memref<8x784xf32, #tpu.memory_space<vmem>>) attributes {dimension_semantics = [#tpu.dimension_semantics<parallel>], iteration_bounds = array<i64: 2>, scalar_prefetch = 0 : i64, scratch_operands = 0 : i64, tpu.core_type = #tpu.core_type<tc>, window_params = [{transform_indices = @transform_0, window_bounds = array<i64: 8, 64>}, {pipeline_mode = #tpu.pipeline_mode<synchronous>, transform_indices = @transform_1, window_bounds = array<i64: 64, 256>}, {pipeline_mode = #tpu.pipeline_mode<synchronous>, transform_indices = @transform_2, window_bounds = array<i64: 1, 256>}, {pipeline_mode = #tpu.pipeline_mode<synchronous>, transform_indices = @transform_3, window_bounds = array<i64: 256, 128>}, {pipeline_mode = #tpu.pipeline_mode<synchronous>, transform_indices = @transform_4, window_bounds = array<i64: 1, 128>}, {pipeline_mode = #tpu.pipeline_mode<synchronous>, transform_indices = @transform_5, window_bounds = array<i64: 128, 784>}, {pipeline_mode = #tpu.pipeline_mode<synchronous>, transform_indices = @transform_6, window_bounds = array<i64: 1, 784>}, {transform_indices = @transform_7, window_bounds = array<i64: 8, 784>}]} {
    %c0 = arith.constant 0 : index
    %c0_0 = arith.constant 0 : index
    %0 = vector.load %arg1[%c0, %c0_0] : memref<8x64xf32, #tpu.memory_space<vmem>>, vector<8x64xf32>
    %c0_1 = arith.constant 0 : index
    %c0_2 = arith.constant 0 : index
    %1 = vector.load %arg2[%c0_1, %c0_2] : memref<64x256xf32, #tpu.memory_space<vmem>>, vector<64x256xf32>
    %cst = arith.constant dense<0.000000e+00> : vector<8x256xf32>
    %2 = tpu.matmul %0, %1, %cst {dimension_numbers = #tpu.dot_dimension_numbers<[1], [0], [0], [1], [0, 0, 1, 1], [], []>} : vector<8x64xf32>, vector<64x256xf32>, vector<8x256xf32> -> vector<8x256xf32>
    %c0_3 = arith.constant 0 : index
    %c0_4 = arith.constant 0 : index
    %3 = vector.load %arg3[%c0_3, %c0_4] : memref<1x256xf32, #tpu.memory_space<vmem>>, vector<1x256xf32>
    %4 = vector.broadcast %3 : vector<1x256xf32> to vector<8x256xf32>
    %5 = arith.addf %2, %4 : vector<8x256xf32>
    %cst_5 = arith.constant 0.000000e+00 : f32
    %6 = vector.broadcast %cst_5 : f32 to vector<8x256xf32>
    %7 = arith.cmpf ogt, %5, %6 : vector<8x256xf32>
    %cst_6 = arith.constant 1.000000e-01 : f32
    %8 = vector.broadcast %cst_6 : f32 to vector<8x256xf32>
    %9 = arith.mulf %8, %5 : vector<8x256xf32>
    %10 = arith.select %7, %5, %9 : vector<8x256xi1>, vector<8x256xf32>
    %c0_7 = arith.constant 0 : index
    %c0_8 = arith.constant 0 : index
    %11 = vector.load %arg4[%c0_7, %c0_8] : memref<256x128xf32, #tpu.memory_space<vmem>>, vector<256x128xf32>
    %cst_9 = arith.constant dense<0.000000e+00> : vector<8x128xf32>
    %12 = tpu.matmul %10, %11, %cst_9 {dimension_numbers = #tpu.dot_dimension_numbers<[1], [0], [0], [1], [0, 0, 1, 1], [], []>} : vector<8x256xf32>, vector<256x128xf32>, vector<8x128xf32> -> vector<8x128xf32>
    %c0_10 = arith.constant 0 : index
    %c0_11 = arith.constant 0 : index
    %13 = vector.load %arg5[%c0_10, %c0_11] : memref<1x128xf32, #tpu.memory_space<vmem>>, vector<1x128xf32>
    %14 = vector.broadcast %13 : vector<1x128xf32> to vector<8x128xf32>
    %15 = arith.addf %12, %14 : vector<8x128xf32>
    %cst_12 = arith.constant 0.000000e+00 : f32
    %16 = vector.broadcast %cst_12 : f32 to vector<8x128xf32>
    %17 = arith.cmpf ogt, %15, %16 : vector<8x128xf32>
    %cst_13 = arith.constant 1.000000e-01 : f32
    %18 = vector.broadcast %cst_13 : f32 to vector<8x128xf32>
    %19 = arith.mulf %18, %15 : vector<8x128xf32>
    %20 = arith.select %17, %15, %19 : vector<8x128xi1>, vector<8x128xf32>
    %c0_14 = arith.constant 0 : index
    %c0_15 = arith.constant 0 : index
    %21 = vector.load %arg6[%c0_14, %c0_15] : memref<128x784xf32, #tpu.memory_space<vmem>>, vector<128x784xf32>
    %cst_16 = arith.constant dense<0.000000e+00> : vector<8x784xf32>
    %22 = tpu.matmul %20, %21, %cst_16 {dimension_numbers = #tpu.dot_dimension_numbers<[1], [0], [0], [1], [0, 0, 1, 1], [], []>} : vector<8x128xf32>, vector<128x784xf32>, vector<8x784xf32> -> vector<8x784xf32>
    %c0_17 = arith.constant 0 : index
    %c0_18 = arith.constant 0 : index
    %23 = vector.load %arg7[%c0_17, %c0_18] : memref<1x784xf32, #tpu.memory_space<vmem>>, vector<1x784xf32>
    %24 = vector.broadcast %23 : vector<1x784xf32> to vector<8x784xf32>
    %25 = arith.addf %22, %24 : vector<8x784xf32>
    %26 = math.tanh %25 : vector<8x784xf32>
    %c0_19 = arith.constant 0 : index
    %c0_20 = arith.constant 0 : index
    %27 = vector.load %arg8[%c0_19, %c0_20] : memref<8x784xf32, #tpu.memory_space<vmem>>, vector<8x784xf32>
    tpu.vector_store %arg8[%c0_19, %c0_20], %26 {strides = array<i32>} : memref<8x784xf32, #tpu.memory_space<vmem>>, vector<8x784xf32>,
    return
  }
  func.func @transform_0(%arg0: i32) -> (i32, i32) {
    %c0_i32 = arith.constant 0 : i32
    %c0_i32_0 = arith.constant 0 : i32
    return %arg0, %c0_i32 : i32, i32
  }
  func.func @transform_1(%arg0: i32) -> (i32, i32) {
    %c0_i32 = arith.constant 0 : i32
    %c0_i32_0 = arith.constant 0 : i32
    %c0_i32_1 = arith.constant 0 : i32
    return %c0_i32, %c0_i32_0 : i32, i32
  }
  func.func @transform_2(%arg0: i32) -> (i32, i32) {
    %c0_i32 = arith.constant 0 : i32
    %c0_i32_0 = arith.constant 0 : i32
    %c0_i32_1 = arith.constant 0 : i32
    return %c0_i32, %c0_i32_0 : i32, i32
  }
  func.func @transform_3(%arg0: i32) -> (i32, i32) {
    %c0_i32 = arith.constant 0 : i32
    %c0_i32_0 = arith.constant 0 : i32
    %c0_i32_1 = arith.constant 0 : i32
    return %c0_i32, %c0_i32_0 : i32, i32
  }
  func.func @transform_4(%arg0: i32) -> (i32, i32) {
    %c0_i32 = arith.constant 0 : i32
    %c0_i32_0 = arith.constant 0 : i32
    %c0_i32_1 = arith.constant 0 : i32
    return %c0_i32, %c0_i32_0 : i32, i32
  }
  func.func @transform_5(%arg0: i32) -> (i32, i32) {
    %c0_i32 = arith.constant 0 : i32
    %c0_i32_0 = arith.constant 0 : i32
    %c0_i32_1 = arith.constant 0 : i32
    return %c0_i32, %c0_i32_0 : i32, i32
  }
  func.func @transform_6(%arg0: i32) -> (i32, i32) {
    %c0_i32 = arith.constant 0 : i32
    %c0_i32_0 = arith.constant 0 : i32
    %c0_i32_1 = arith.constant 0 : i32
    return %c0_i32, %c0_i32_0 : i32, i32
  }
  func.func @transform_7(%arg0: i32) -> (i32, i32) {
    %c0_i32 = arith.constant 0 : i32
    %c0_i32_0 = arith.constant 0 : i32
    return %arg0, %c0_i32 : i32, i32
  }
}

</mosaic_0001>

<bundles_post_ra>
// kernel: generator_forward.1
= control target key start
LH: loop header
LB: loop body
LE: loop exit
PB: predicated region body
PF: predicated region fallthrough
CT: control target
= control target key end

     0   :  { %12 = vsyncpa [#allocation3], 0  ;;  %s1536_s0 = inlined_call_operand.vmem [shape: f32[16,64], index: 0, kind: input, shape index: {}]   ;;  %s1537_s1 = inlined_call_operand.vmem [shape: f32[64,256], index: 1, kind: input, shape index: {}]   ;;  %s1538_s2 = inlined_call_operand.vmem [shape: f32[1,256], index: 2, kind: input, shape index: {}]   ;;  %s1539_s3 = inlined_call_operand.vmem [shape: f32[256,128], index: 3, kind: input, shape index: {}]   ;;  %s1540_s4 = inlined_call_operand.vmem [shape: f32[1,128], index: 4, kind: input, shape index: {}]   ;;  %s1541_s5 = inlined_call_operand.vmem [shape: f32[128,784], index: 5, kind: input, shape index: {}]   ;;  %s1542_s6 = inlined_call_operand.vmem [shape: f32[1,784], index: 6, kind: input, shape index: {}]   ;;  %s1543_s7 = inlined_call_operand.hbm [shape: f32[16,784], index: 7, kind: output, shape index: {}]  }
   0x1   :  { %14 = vsyncpa [#allocation3 + $0x1], 0  ;;  %s955_s24 = smov 0   ;;  %s957_s25 = smov 0  }
   0x2   :  { %s959_s26 = smov 0   ;;  %s961_s27 = smov 0  }
   0x3 LB: > { %s976_s28 = sadd.s32 4294967295, %s913_s27   ;;  %s785_s29 = sadd.s32 4294967294, %s913_s27   ;;  %s913_s27 = sphi %s961_s27, %s1549_s27   ;;  %s909_s26 = sphi %s959_s26, %s1548_s26   ;;  %s905_s25 = sphi %s957_s25, %s1547_s25   ;;  %s901_s24 = sphi %s955_s24, %s1546_s24  }
   0x4   : > { %s980_s30 = sadd.s32 1, %s913_s27   ;;  %s179_s8 = sadd.s32 1, %s909_s26 }
   0x5   : > { %s176_s9 = ssub.s32 %s913_s27, %s980_s30  ;;  %p189_p0 = scmp.ne.s32.totalorder %s909_s26, %s905_s25 }
   0x6   : > { %p177_p1 = scmp.eq.s32.totalorder %s176_s9, 0  ;;  %p190_p2 = scmp.eq.s32.totalorder %s976_s28, 1 }
   0x7   : > { %p195_p3 = scmp.ne.s32.totalorder %s905_s25, %s901_s24  ;;  %p196_p4 = scmp.eq.s32.totalorder %s785_s29, 1 }
   0x8   : > { %s991_s10 = scalar_select %p177_p1, %s909_s26, %s179_s8  }
   0x9   : > { %p993_p5 = por %p190_p2, %p189_p0  ;;  %p997_p6 = por %p196_p4, %p195_p3 }
   0xa   : > { %p788_p7 = scmp.ge.s32.totalorder %s913_s27, 1  ;;  %p239_p8 = scmp.lt.s32.totalorder %s913_s27, 3 }
   0xc   : > { %p240_p9 = pnand %p788_p7, %p239_p8 }
   0xd   : > { %p270_p10 = scmp.lt.s32.totalorder (!%p240_p9), %s976_s28, 1  ;;  %s796_s13 = smul.u32 (!%p240_p9), 56, %s976_s28 }
   0xe   : > { %243 = sbr.rel (%p240_p9) target bundleno = 458 (0x1ca), region = 48  ;;  %s871_s23 = scalar_lea.hbm (!%p240_p9), %s1543_s7, 112 }
  0x13   : > { %v289_v0 = vld [vmem:[%s1537_s1 + $0x70] sm:$0xff]  ;;  %v290_v1 = vld [vmem:[%s1537_s1 + $0x78] sm:$0xff]  ;;  %v287_v2 = vld [vmem:[%s1537_s1 + $0x60] sm:$0xff]  ;;  %s1023_s8 = scalar_select %p270_p10, %s976_s28, 1  ;;  %vm297_vm0 = vcmask 523264   ;;  %vm707_vm4 = vcmask 130048  }
  0x14   : > { %309 = vmatpush.msra.mxu0 %v289_v0  ;;  %329 = vmatpush.msra.mxu1 %v290_v1  ;;  %v288_v3 = vld [vmem:[%s1537_s1 + $0x68] sm:$0xff]  ;;  %v285_v4 = vld [vmem:[%s1537_s1 + $0x50] sm:$0xff]  ;;  %v286_v5 = vld [vmem:[%s1537_s1 + $0x58] sm:$0xff] }
  0x15   : > { %v283_v6 = vld [vmem:[%s1537_s1 + $0x40] sm:$0xff]  ;;  %v284_v7 = vld [vmem:[%s1537_s1 + $0x48] sm:$0xff]  ;;  %v281_v8 = vld [vmem:[%s1537_s1 + $0x30] sm:$0xff]  ;;  %s789_s15 = sshll.u32 %s1023_s8, 3  ;;  %s267_s8 = sand.u32 1, %s905_s25  }
  0x16   : > { %310 = vmatpush.msra.mxu0 %v287_v2  ;;  %330 = vmatpush.msra.mxu1 %v288_v3  ;;  %v362_v9 = vld [vmem:[%s1539_s3 + $0x78] sm:$0xff]  ;;  %v361_v12 = vld [vmem:[%s1539_s3 + $0x70] sm:$0xff]  ;;  %v360_v14 = vld [vmem:[%s1539_s3 + $0x68] sm:$0xff]  ;;  %s273_s21 = scalar_lea.vmem %s1536_s0, %s789_s15  ;;  %s795_s29 = smul.u32 56, %s267_s8 }
  0x17   : > { %v378_v10 = vld [vmem:[%s1539_s3 + $0xf8] sm:$0xff]  ;;  %383 = vmatpush.msra.mxu2 %v362_v9  ;;  %v377_v13 = vld [vmem:[%s1539_s3 + $0xf0] sm:$0xff]  ;;  %v376_v15 = vld [vmem:[%s1539_s3 + $0xe8] sm:$0xff]  ;;  %s721_s15 = scalar_lea.hbm %s1543_s7, %s796_s13  ;;  %s710_s28 = scalar_lea.sflag [#allocation3], %s267_s8 }
  0x18   : > { %311 = vmatpush.msra.mxu0 %v285_v4  ;;  %331 = vmatpush.msra.mxu1 %v286_v5  ;;  %v282_v11 = vld [vmem:[%s1537_s1 + $0x38] sm:$0xff]  ;;  %v279_v16 = vld [vmem:[%s1537_s1 + $0x20] sm:$0xff]  ;;  %v280_v17 = vld [vmem:[%s1537_s1 + $0x28] sm:$0xff]  ;;  %s269_s9 = scalar_lea.vmem [#allocation2], %s795_s29  ;;  %s725_s18 = sshll.u32 %s721_s15, 4  ;;  %s726_s18 = int_to_ptr.hbm [resolvable:$true] %s725_s18 }
  0x19   : > { %403 = vmatpush.msra.mxu3 %v378_v10  ;;  %384 = vmatpush.msra.mxu2 %v361_v12  ;;  %v359_v18 = vld [vmem:[%s1539_s3 + $0x60] sm:$0xff]  ;;  %v277_v20 = vld [vmem:[%s1537_s1 + $0x10] sm:$0xff]  ;;  %v278_v21 = vld [vmem:[%s1537_s1 + $0x18] sm:$0xff]  ;;  %s723_s17 = sshll.u32 %s269_s9, 4  ;;  %s865_s19 = sshra.s32 %s726_s18, 4  ;;  %s724_s17 = int_to_ptr.vmem [resolvable:$true] %s723_s17  ;;  %s866_s19 = int_to_ptr.hbm [resolvable:$true] %s865_s19 }
  0x1a   : > { %312 = vmatpush.msra.mxu0 %v283_v6  ;;  %332 = vmatpush.msra.mxu1 %v284_v7  ;;  %v375_v19 = vld [vmem:[%s1539_s3 + $0xe0] sm:$0xff]  ;;  %v358_v22 = vld [vmem:[%s1539_s3 + $0x58] sm:$0xff]  ;;  %v276_v25 = vld [vmem:[%s1537_s1 + $0x8] sm:$0xff]  ;;  %s867_s20 = scalar_lea.hbm %s866_s19, 56  ;;  %p872_p0 = scmp.lt.s32.totalorder %s866_s19, %s1543_s7 }
  0x1b   : > { %404 = vmatpush.msra.mxu3 %v377_v13  ;;  %385 = vmatpush.msra.mxu2 %v360_v14  ;;  %v374_v23 = vld [vmem:[%s1539_s3 + $0xd8] sm:$0xff]  ;;  %v275_v24 = vld [vmem:[%s1537_s1] sm:$0xff]  ;;  %v357_v27 = vld [vmem:[%s1539_s3 + $0x50] sm:$0xff]  ;;  %p868_p11 = scmp.ne.s32.totalorder %s866_s19, %s867_s20  ;;  %p873_p1 = scmp.lt.s32.totalorder %s871_s23, %s867_s20 }
  0x1c   : > { %313 = vmatpush.msra.mxu0 %v281_v8  ;;  %333 = vmatpush.msra.mxu1 %v282_v11  ;;  %v274_v26 = vld [vmem:[%s273_s21] sm:$0xff]  ;;  %v373_v28 = vld [vmem:[%s1539_s3 + $0xd0] sm:$0xff]  ;;  %v356_v29 = vld [vmem:[%s1539_s3 + $0x48] sm:$0xff] }
  0x1d   : > { %405 = vmatpush.msra.mxu3 %v376_v15  ;;  %386 = vmatpush.msra.mxu2 %v359_v18  ;;  %v372_v30 = vld [vmem:[%s1539_s3 + $0xc8] sm:$0xff]  ;;  %v355_v31 = vld [vmem:[%s1539_s3 + $0x40] sm:$0xff]  ;;  %v354_v33 = vld [vmem:[%s1539_s3 + $0x38] sm:$0xff]  ;;  %p869_p12 = pnand %p868_p11, %p993_p5  ;;  %p874_p2 = por %p873_p1, %p872_p0 }
  0x1e   : > { %314 = vmatpush.msra.mxu0 %v279_v16  ;;  %334 = vmatpush.msra.mxu1 %v280_v17  ;;  %v371_v32 = vld [vmem:[%s1539_s3 + $0xc0] sm:$0xff]  ;;  %v370_v34 = vld [vmem:[%s1539_s3 + $0xb8] sm:$0xff]  ;;  %v353_v35 = vld [vmem:[%s1539_s3 + $0x30] sm:$0xff] }
  0x1f   : > { %406 = vmatpush.msra.mxu3 %v375_v19  ;;  %387 = vmatpush.msra.mxu2 %v358_v22  ;;  %v369_v36 = vld [vmem:[%s1539_s3 + $0xb0] sm:$0xff]  ;;  %v352_v37 = vld [vmem:[%s1539_s3 + $0x28] sm:$0xff]  ;;  %v351_v39 = vld [vmem:[%s1539_s3 + $0x20] sm:$0xff]  ;;  %p870_p13 = pneg %p869_p12 }
  0x20   : > { %315 = vmatpush.msra.mxu0 %v277_v20  ;;  %335 = vmatpush.msra.mxu1 %v278_v21  ;;  %v368_v38 = vld [vmem:[%s1539_s3 + $0xa8] sm:$0xff]  ;;  %v367_v40 = vld [vmem:[%s1539_s3 + $0xa0] sm:$0xff]  ;;  %v350_v41 = vld [vmem:[%s1539_s3 + $0x18] sm:$0xff] }
  0x21   : > { %407 = vmatpush.msra.mxu3 %v374_v23  ;;  %388 = vmatpush.msra.mxu2 %v357_v27  ;;  %v366_v42 = vld [vmem:[%s1539_s3 + $0x98] sm:$0xff]  ;;  %v349_v43 = vld [vmem:[%s1539_s3 + $0x10] sm:$0xff]  ;;  %v348_v45 = vld [vmem:[%s1539_s3 + $0x8] sm:$0xff]  ;;  %p875_p3 = pnand %p874_p2, %p870_p13 }
  0x22   : > { %316 = vmatpush.msra.mxu0 %v275_v24  ;;  %336 = vmatpush.msra.mxu1 %v276_v25  ;;  %v365_v44 = vld [vmem:[%s1539_s3 + $0x90] sm:$0xff]  ;;  %v364_v46 = vld [vmem:[%s1539_s3 + $0x88] sm:$0xff]  ;;  %v347_v47 = vld [vmem:[%s1539_s3] sm:$0xff] }
  0x23   : > { %790 = vmatmul.msk.f32.vlgmr.msra.gmra.mxu0 %vm297_vm0, %v274_v26  ;;  %791 = vmatmul.msk.f32.vlgmr.msra.gmra.mxu1 %vm297_vm0, %v274_v26  ;;  %v363_v48 = vld [vmem:[%s1539_s3 + $0x80] sm:$0xff]  ;;  %v531_v49 = vld [vmem:[%s1541_s5 + $0x348] sm:$0xff]  ;;  %v532_v50 = vld [vmem:[%s1541_s5 + $0x350] sm:$0xff] }
  0x24   : > { %408 = vmatpush.msra.mxu3 %v373_v28  ;;  %389 = vmatpush.msra.mxu2 %v356_v29  ;;  %v533_v51 = vld [vmem:[%s1541_s5 + $0x358] sm:$0xff]  ;;  %v524_v52 = vld [vmem:[%s1541_s5 + $0x310] sm:$0xff]  ;;  %v526_v54 = vld [vmem:[%s1541_s5 + $0x320] sm:$0xff] }
  0x25   : > { %554 = vmatpush.msrb.mxu0 %v531_v49  ;;  %574 = vmatpush.msrb.mxu1 %v532_v50  ;;  %v525_v53 = vld [vmem:[%s1541_s5 + $0x318] sm:$0xff]  ;;  %v518_v56 = vld [vmem:[%s1541_s5 + $0x2e0] sm:$0xff]  ;;  %v519_v57 = vld [vmem:[%s1541_s5 + $0x2e8] sm:$0xff] }
  0x26   : > { %409 = vmatpush.msra.mxu3 %v372_v30  ;;  %390 = vmatpush.msra.mxu2 %v355_v31  ;;  %v517_v55 = vld [vmem:[%s1541_s5 + $0x2d8] sm:$0xff]  ;;  %v510_v58 = vld [vmem:[%s1541_s5 + $0x2a0] sm:$0xff]  ;;  %v511_v59 = vld [vmem:[%s1541_s5 + $0x2a8] sm:$0xff] }
  0x27   : > { %555 = vmatpush.msrb.mxu0 %v524_v52  ;;  %575 = vmatpush.msrb.mxu1 %v525_v53  ;;  %v512_v60 = vld [vmem:[%s1541_s5 + $0x2b0] sm:$0xff]  ;;  %v503_v61 = vld [vmem:[%s1541_s5 + $0x268] sm:$0xff]  ;;  %v505_v63 = vld [vmem:[%s1541_s5 + $0x278] sm:$0xff] }
  0x28   : > { %410 = vmatpush.msra.mxu3 %v371_v32  ;;  %391 = vmatpush.msra.mxu2 %v354_v33  ;;  %v504_v62 = vld [vmem:[%s1541_s5 + $0x270] sm:$0xff]  ;;  %v497_v1 = vld [vmem:[%s1541_s5 + $0x238] sm:$0xff]  ;;  %v498_v2 = vld [vmem:[%s1541_s5 + $0x240] sm:$0xff] }
  0x29   : > { %556 = vmatpush.msrb.mxu0 %v517_v55  ;;  %576 = vmatpush.msrb.mxu1 %v518_v56  ;;  %v496_v0 = vld [vmem:[%s1541_s5 + $0x230] sm:$0xff]  ;;  %v489_v3 = vld [vmem:[%s1541_s5 + $0x1f8] sm:$0xff]  ;;  %v490_v4 = vld [vmem:[%s1541_s5 + $0x200] sm:$0xff] }
  0x2a   : > { %411 = vmatpush.msra.mxu3 %v370_v34  ;;  %392 = vmatpush.msra.mxu2 %v353_v35  ;;  %v491_v5 = vld [vmem:[%s1541_s5 + $0x208] sm:$0xff]  ;;  %v482_v6 = vld [vmem:[%s1541_s5 + $0x1c0] sm:$0xff]  ;;  %v484_v9 = vld [vmem:[%s1541_s5 + $0x1d0] sm:$0xff] }
  0x2b   : > { %557 = vmatpush.msrb.mxu0 %v510_v58  ;;  %577 = vmatpush.msrb.mxu1 %v511_v59  ;;  %v483_v7 = vld [vmem:[%s1541_s5 + $0x1c8] sm:$0xff]  ;;  %v534_v8 = vld [vmem:[%s1541_s5 + $0x360] sm:$0xff]  ;;  %v476_v12 = vld [vmem:[%s1541_s5 + $0x190] sm:$0xff] }
  0x2c   : > { %412 = vmatpush.msra.mxu3 %v369_v36  ;;  %393 = vmatpush.msra.mxu2 %v352_v37  ;;  %v527_v10 = vld [vmem:[%s1541_s5 + $0x328] sm:$0xff]  ;;  %v477_v13 = vld [vmem:[%s1541_s5 + $0x198] sm:$0xff]  ;;  %v520_v14 = vld [vmem:[%s1541_s5 + $0x2f0] sm:$0xff] }
  0x2d   : > { %558 = vmatpush.msrb.mxu0 %v503_v61  ;;  %578 = vmatpush.msrb.mxu1 %v504_v62  ;;  %v475_v11 = vld [vmem:[%s1541_s5 + $0x188] sm:$0xff]  ;;  %v468_v15 = vld [vmem:[%s1541_s5 + $0x150] sm:$0xff]  ;;  %v469_v16 = vld [vmem:[%s1541_s5 + $0x158] sm:$0xff] }
  0x2e   : > { %413 = vmatpush.msra.mxu3 %v368_v38  ;;  %394 = vmatpush.msra.mxu2 %v351_v39  ;;  %v470_v17 = vld [vmem:[%s1541_s5 + $0x160] sm:$0xff]  ;;  %v513_v18 = vld [vmem:[%s1541_s5 + $0x2b8] sm:$0xff]  ;;  %v463_v21 = vld [vmem:[%s1541_s5 + $0x128] sm:$0xff] }
  0x2f   : > { %559 = vmatpush.msrb.mxu0 %v496_v0  ;;  %579 = vmatpush.msrb.mxu1 %v497_v1  ;;  %v461_v19 = vld [vmem:[%s1541_s5 + $0x118] sm:$0xff]  ;;  %v462_v20 = vld [vmem:[%s1541_s5 + $0x120] sm:$0xff]  ;;  %v455_v25 = vld [vmem:[%s1541_s5 + $0xe8] sm:$0xff] }
  0x30   : > { %414 = vmatpush.msra.mxu3 %v367_v40  ;;  %395 = vmatpush.msra.mxu2 %v350_v41  ;;  %v506_v22 = vld [vmem:[%s1541_s5 + $0x280] sm:$0xff]  ;;  %v456_v26 = vld [vmem:[%s1541_s5 + $0xf0] sm:$0xff]  ;;  %v499_v27 = vld [vmem:[%s1541_s5 + $0x248] sm:$0xff] }
  0x31   : > { %560 = vmatpush.msrb.mxu0 %v489_v3  ;;  %580 = vmatpush.msrb.mxu1 %v490_v4  ;;  %v291_v23 = vld [vmem:[%s1538_s2] sm:$0x3]  ;;  %v447_v28 = vld [vmem:[%s1541_s5 + $0xa8] sm:$0xff]  ;;  %v448_v29 = vld [vmem:[%s1541_s5 + $0xb0] sm:$0xff] }
  0x32   : > { %415 = vmatpush.msra.mxu3 %v366_v42  ;;  %396 = vmatpush.msra.mxu2 %v349_v43  ;;  %v454_v24 = vld [vmem:[%s1541_s5 + $0xe0] sm:$0xff]  ;;  %v293_v30 = vperm.slane %v291_v23, 0  ;;  %v294_v31 = vperm.slane %v291_v23, 1  ;;  %v449_v32 = vld [vmem:[%s1541_s5 + $0xb8] sm:$0xff]  ;;  %v492_v33 = vld [vmem:[%s1541_s5 + $0x210] sm:$0xff] }
  0x33   : > { %561 = vmatpush.msrb.mxu0 %v482_v6  ;;  %581 = vmatpush.msrb.mxu1 %v483_v7  ;;  %v440_v34 = vld [vmem:[%s1541_s5 + $0x70] sm:$0xff]  ;;  %v441_v35 = vld [vmem:[%s1541_s5 + $0x78] sm:$0xff]  ;;  %v442_v36 = vld [vmem:[%s1541_s5 + $0x80] sm:$0xff] }
  0x34   : > { %416 = vmatpush.msra.mxu3 %v365_v44  ;;  %397 = vmatpush.msra.mxu2 %v348_v45  ;;  %v485_v37 = vld [vmem:[%s1541_s5 + $0x1d8] sm:$0xff]  ;;  %v434_v41 = vld [vmem:[%s1541_s5 + $0x40] sm:$0xff]  ;;  %v435_v44 = vld [vmem:[%s1541_s5 + $0x48] sm:$0xff] }
  0x35   : > { %562 = vmatpush.msrb.mxu0 %v475_v11  ;;  %582 = vmatpush.msrb.mxu1 %v476_v12  ;;  %v433_v40 = vld [vmem:[%s1541_s5 + $0x38] sm:$0xff]  ;;  %v478_v45 = vld [vmem:[%s1541_s5 + $0x1a0] sm:$0xff]  ;;  %v428_v50 = vld [vmem:[%s1541_s5 + $0x10] sm:$0xff] }
  0x36   : > { %417 = vmatpush.msra.mxu3 %v364_v46  ;;  %398 = vmatpush.msra.mxu2 %v347_v47  ;;  %v426_v46 = vld [vmem:[%s1541_s5] sm:$0xff]  ;;  %v427_v47 = vld [vmem:[%s1541_s5 + $0x8] sm:$0xff]  ;;  %v537_v55 = vld [vmem:[%s1541_s5 + $0x378] sm:$0xff] }
  0x37   : > { %563 = vmatpush.msrb.mxu0 %v468_v15  ;;  %583 = vmatpush.msrb.mxu1 %v469_v16  ;;  %v528_v56 = vld [vmem:[%s1541_s5 + $0x330] sm:$0xff]  ;;  %v529_v58 = vld [vmem:[%s1541_s5 + $0x338] sm:$0xff]  ;;  %v530_v59 = vld [vmem:[%s1541_s5 + $0x340] sm:$0xff] }
  0x38   : > { %418 = vmatpush.msra.mxu3 %v363_v48  ;;  %594 = vmatpush.msrb.mxu2 %v533_v51  ;;  %v535_v51 = vld [vmem:[%s1541_s5 + $0x368] sm:$0xff]  ;;  %v464_v61 = vld [vmem:[%s1541_s5 + $0x130] sm:$0xff]  ;;  %v522_v62 = vld [vmem:[%s1541_s5 + $0x300] sm:$0xff] }
  0x39   : > { %564 = vmatpush.msrb.mxu0 %v461_v19  ;;  %584 = vmatpush.msrb.mxu1 %v462_v20  ;;  %v514_v0 = vld [vmem:[%s1541_s5 + $0x2c0] sm:$0xff]  ;;  %v457_v1 = vld [vmem:[%s1541_s5 + $0xf8] sm:$0xff]  ;;  %v516_v3 = vld [vmem:[%s1541_s5 + $0x2d0] sm:$0xff] }
  0x3a   : > { %595 = vmatpush.msrb.mxu2 %v526_v54  ;;  %614 = vmatpush.msrb.mxu3 %v534_v8  ;;  %v536_v54 = vld [vmem:[%s1541_s5 + $0x370] sm:$0xff]  ;;  %v507_v4 = vld [vmem:[%s1541_s5 + $0x288] sm:$0xff]  ;;  %v509_v6 = vld [vmem:[%s1541_s5 + $0x298] sm:$0xff] }
  0x3b   : > { %565 = vmatpush.msrb.mxu0 %v454_v24  ;;  %585 = vmatpush.msrb.mxu1 %v455_v25  ;;  %v500_v7 = vld [vmem:[%s1541_s5 + $0x250] sm:$0xff]  ;;  %v501_v8 = vld [vmem:[%s1541_s5 + $0x258] sm:$0xff]  ;;  %v494_v11 = vld [vmem:[%s1541_s5 + $0x220] sm:$0xff] }
  0x3c   : > { %596 = vmatpush.msrb.mxu2 %v519_v57  ;;  %615 = vmatpush.msrb.mxu3 %v527_v10  ;;  %v471_v57 = vld [vmem:[%s1541_s5 + $0x168] sm:$0xff]  ;;  %v493_v10 = vld [vmem:[%s1541_s5 + $0x218] sm:$0xff]  ;;  %v488_v15 = vld [vmem:[%s1541_s5 + $0x1f0] sm:$0xff] }
  0x3d   : > { %566 = vmatpush.msrb.mxu0 %v447_v28  ;;  %586 = vmatpush.msrb.mxu1 %v448_v29  ;;  %v495_v12 = vld [vmem:[%s1541_s5 + $0x228] sm:$0xff]  ;;  %v450_v16 = vld [vmem:[%s1541_s5 + $0xc0] sm:$0xff]  ;;  %v481_v19 = vld [vmem:[%s1541_s5 + $0x1b8] sm:$0xff] }
  0x3e   : > { %597 = vmatpush.msrb.mxu2 %v512_v60  ;;  %616 = vmatpush.msrb.mxu3 %v520_v14  ;;  %v521_v60 = vld [vmem:[%s1541_s5 + $0x2f8] sm:$0xff]  ;;  %v487_v14 = vld [vmem:[%s1541_s5 + $0x1e8] sm:$0xff]  ;;  %v474_v23 = vld [vmem:[%s1541_s5 + $0x180] sm:$0xff] }
  0x3f   : > { %567 = vmatpush.msrb.mxu0 %v440_v34  ;;  %587 = vmatpush.msrb.mxu1 %v441_v35  ;;  %v443_v20 = vld [vmem:[%s1541_s5 + $0x88] sm:$0xff]  ;;  %v436_v24 = vld [vmem:[%s1541_s5 + $0x50] sm:$0xff]  ;;  %v465_v25 = vld [vmem:[%s1541_s5 + $0x138] sm:$0xff] }
  0x40   : > { %598 = vmatpush.msrb.mxu2 %v505_v63  ;;  %617 = vmatpush.msrb.mxu3 %v513_v18  ;;  %v523_v63 = vld [vmem:[%s1541_s5 + $0x308] sm:$0xff]  ;;  %v480_v18 = vld [vmem:[%s1541_s5 + $0x1b0] sm:$0xff]  ;;  %v429_v28 = vld [vmem:[%s1541_s5 + $0x18] sm:$0xff] }
  0x41   : > { %568 = vmatpush.msrb.mxu0 %v433_v40  ;;  %588 = vmatpush.msrb.mxu1 %v434_v41  ;;  %v458_v29 = vld [vmem:[%s1541_s5 + $0x100] sm:$0xff]  ;;  %v453_v34 = vld [vmem:[%s1541_s5 + $0xd8] sm:$0xff]  ;;  %v444_v35 = vld [vmem:[%s1541_s5 + $0x90] sm:$0xff] }
  0x42   : > { %599 = vmatpush.msrb.mxu2 %v498_v2  ;;  %618 = vmatpush.msrb.mxu3 %v506_v22  ;;  %v515_v2 = vld [vmem:[%s1541_s5 + $0x2c8] sm:$0xff]  ;;  %v473_v22 = vld [vmem:[%s1541_s5 + $0x178] sm:$0xff]  ;;  %v430_v41 = vld [vmem:[%s1541_s5 + $0x20] sm:$0xff] }
  0x43   : > { %569 = vmatpush.msrb.mxu0 %v426_v46  ;;  %589 = vmatpush.msrb.mxu1 %v427_v47  ;;  %v439_v40 = vld [vmem:[%s1541_s5 + $0x68] sm:$0xff] }
  0x44   : > { %600 = vmatpush.msrb.mxu2 %v491_v5  ;;  %619 = vmatpush.msrb.mxu3 %v499_v27  ;;  %v508_v5 = vld [vmem:[%s1541_s5 + $0x290] sm:$0xff]  ;;  %v467_v27 = vld [vmem:[%s1541_s5 + $0x148] sm:$0xff] }
  0x45   : > { %634 = vmatpush.msra.mxu0 %v535_v51  ;;  %654 = vmatpush.msra.mxu1 %v536_v54  ;;  %v538_v51 = vld [vmem:[%s1542_s6] sm:$0x7f] }
  0x46   : > { %601 = vmatpush.msrb.mxu2 %v484_v9  ;;  %620 = vmatpush.msrb.mxu3 %v492_v33  ;;  %v502_v9 = vld [vmem:[%s1541_s5 + $0x260] sm:$0xff]  ;;  %v452_v33 = vld [vmem:[%s1541_s5 + $0xd0] sm:$0xff] }
  0x47   : > { %635 = vmatpush.msra.mxu0 %v528_v56  ;;  %655 = vmatpush.msra.mxu1 %v529_v58  ;;  %v542_v58 = vperm.slane %v538_v51, 2 }
  0x48   : > { %602 = vmatpush.msrb.mxu2 %v477_v13  ;;  %621 = vmatpush.msrb.mxu3 %v485_v37  ;;  %v486_v13 = vld [vmem:[%s1541_s5 + $0x1e0] sm:$0xff] }
  0x49   : > { %636 = vmatpush.msra.mxu0 %v521_v60  ;;  %656 = vmatpush.msra.mxu1 %v522_v62  ;;  %v446_v37 = vld [vmem:[%s1541_s5 + $0xa0] sm:$0xff]  ;;  %v544_v60 = vperm.slane %v538_v51, 4 }
  0x4a   : > { %603 = vmatpush.msrb.mxu2 %v470_v17  ;;  %622 = vmatpush.msrb.mxu3 %v478_v45  ;;  %v479_v17 = vld [vmem:[%s1541_s5 + $0x1a8] sm:$0xff] }
  0x4b   : > { %637 = vmatpush.msra.mxu0 %v514_v0  ;;  %657 = vmatpush.msra.mxu1 %v515_v2 }
  0x4c   : > { %604 = vmatpush.msrb.mxu2 %v463_v21  ;;  %623 = vmatpush.msrb.mxu3 %v471_v57  ;;  %v472_v21 = vld [vmem:[%s1541_s5 + $0x170] sm:$0xff] }
  0x4d   : > { %638 = vmatpush.msra.mxu0 %v507_v4  ;;  %658 = vmatpush.msra.mxu1 %v508_v5 }
  0x4e   : > { %605 = vmatpush.msrb.mxu2 %v456_v26  ;;  %624 = vmatpush.msrb.mxu3 %v464_v61  ;;  %v466_v26 = vld [vmem:[%s1541_s5 + $0x140] sm:$0xff]  ;;  %v545_v61 = vperm.slane %v538_v51, 5 }
  0x4f   : > { %639 = vmatpush.msra.mxu0 %v500_v7  ;;  %659 = vmatpush.msra.mxu1 %v501_v8  ;;  %v546_v8 = vperm.slane %v538_v51, 6 }
  0x50   : > { %606 = vmatpush.msrb.mxu2 %v449_v32  ;;  %625 = vmatpush.msrb.mxu3 %v457_v1  ;;  %v451_v32 = vld [vmem:[%s1541_s5 + $0xc8] sm:$0xff] }
  0x51   : > { %640 = vmatpush.msra.mxu0 %v493_v10  ;;  %660 = vmatpush.msra.mxu1 %v494_v11 }
  0x52   : > { %607 = vmatpush.msrb.mxu2 %v442_v36  ;;  %626 = vmatpush.msrb.mxu3 %v450_v16  ;;  %v445_v36 = vld [vmem:[%s1541_s5 + $0x98] sm:$0xff] }
  0x53   : > { %641 = vmatpush.msra.mxu0 %v486_v13  ;;  %661 = vmatpush.msra.mxu1 %v487_v14 }
  0x54   : > { %608 = vmatpush.msrb.mxu2 %v435_v44  ;;  %627 = vmatpush.msrb.mxu3 %v443_v20  ;;  %v836_v44 = vld [vmem:[%s1540_s4] ss:$0 sm:$0xff] }
  0x55   : > { %642 = vmatpush.msra.mxu0 %v479_v17  ;;  %662 = vmatpush.msra.mxu1 %v480_v18 }
  0x56   : > { %609 = vmatpush.msrb.mxu2 %v428_v50  ;;  %628 = vmatpush.msrb.mxu3 %v436_v24 }
  0x57   : > { %643 = vmatpush.msra.mxu0 %v472_v21  ;;  %663 = vmatpush.msra.mxu1 %v473_v22 }
  0x58   : > { %629 = vmatpush.msrb.mxu3 %v429_v28 }
  0x59   : > { %644 = vmatpush.msra.mxu0 %v465_v25  ;;  %664 = vmatpush.msra.mxu1 %v466_v26 }
  0x5b   : > { %645 = vmatpush.msra.mxu0 %v458_v29 }
  0x5d   : > { %646 = vmatpush.msra.mxu0 %v451_v32 }
  0x5f   : > { %647 = vmatpush.msra.mxu0 %v444_v35 }
  0xa0   : > { %v318_v38 = vpop.f32.mrf.mxu0  ;;  %v338_v39 = vpop.f32.mrf.mxu1 }
  0xa1   : > { %v319_v42 = vadd.f32 %v318_v38, %v293_v30  ;;  %v339_v43 = vadd.f32 %v338_v39, %v294_v31  ;;  %v459_v30 = vld [vmem:[%s1541_s5 + $0x108] sm:$0xff]  ;;  %v460_v31 = vld [vmem:[%s1541_s5 + $0x110] sm:$0xff]  ;;  %v437_v38 = vld [vmem:[%s1541_s5 + $0x58] sm:$0xff] }
  0xa2   : > { %665 = vmatpush.msra.mxu1 %v459_v30  ;;  %v438_v39 = vld [vmem:[%s1541_s5 + $0x60] sm:$0xff]  ;;  %648 = vmatpush.msra.mxu0 %v437_v38 }
  0xa3   : > { %vm341_vm1 = vcmp.gt.f32.partialorder %v319_v42, 0.0  ;;  %v343_v48 = vmul.f32 0.1, %v319_v42  ;;  %vm342_vm2 = vcmp.gt.f32.partialorder %v339_v43, 0.0  ;;  %v344_v49 = vmul.f32 0.1, %v339_v43 }
  0xa4   : > { %666 = vmatpush.msra.mxu1 %v452_v33  ;;  %649 = vmatpush.msra.mxu0 %v430_v41 }
  0xa5   : > { %v345_v52 = vsel %vm341_vm1, %v319_v42, %v343_v48  ;;  %v346_v53 = vsel %vm342_vm2, %v339_v43, %v344_v49  ;;  %v431_v42 = vld [vmem:[%s1541_s5 + $0x28] sm:$0xff]  ;;  %v432_v43 = vld [vmem:[%s1541_s5 + $0x30] sm:$0xff] }
  0xa6   : > { %399 = vmatmul.f32.vlgmr.msra.gmra.mxu2 %v345_v52  ;;  %419 = vmatmul.f32.vlgmr.msra.gmra.mxu3 %v346_v53  ;;  %v540_v52 = vperm.slane %v538_v51, 0  ;;  %v541_v53 = vperm.slane %v538_v51, 1 }
  0xa7   : > { %674 = vmatpush.msra.mxu2 %v537_v55  ;;  %667 = vmatpush.msra.mxu1 %v445_v36 }
  0xa9   : > { %675 = vmatpush.msra.mxu2 %v530_v59  ;;  %668 = vmatpush.msra.mxu1 %v438_v39  ;;  %v543_v59 = vperm.slane %v538_v51, 3 }
  0xab   : > { %676 = vmatpush.msra.mxu2 %v523_v63  ;;  %669 = vmatpush.msra.mxu1 %v431_v42 }
  0xad   : > { %677 = vmatpush.msra.mxu2 %v516_v3 }
  0xaf   : > { %678 = vmatpush.msra.mxu2 %v509_v6 }
  0xb1   : > { %679 = vmatpush.msra.mxu2 %v502_v9 }
  0xb3   : > { %680 = vmatpush.msra.mxu2 %v495_v12 }
  0xb5   : > { %681 = vmatpush.msra.mxu2 %v488_v15 }
  0xb7   : > { %682 = vmatpush.msra.mxu2 %v481_v19 }
  0xb9   : > { %683 = vmatpush.msra.mxu2 %v474_v23 }
  0xbb   : > { %684 = vmatpush.msra.mxu2 %v467_v27 }
  0xbd   : > { %685 = vmatpush.msra.mxu2 %v460_v31 }
  0xbf   : > { %686 = vmatpush.msra.mxu2 %v453_v34 }
  0xc1   : > { %687 = vmatpush.msra.mxu2 %v446_v37 }
  0xc3   : > { %688 = vmatpush.msra.mxu2 %v439_v40 }
  0xc5   : > { %689 = vmatpush.msra.mxu2 %v432_v43 }
 0x129   : > { %v400_v45 = vpop.f32.mrf.mxu2  ;;  %v420_v47 = vpop.f32.mrf.mxu3 }
 0x12a   : > { %v401_v46 = vadd.f32 %v836_v44, %v400_v45 }
 0x12c   : > { %v421_v48 = vadd.f32 %v420_v47, %v401_v46 }
 0x12e   : > { %vm423_vm3 = vcmp.gt.f32.partialorder %v421_v48, 0.0  ;;  %v424_v49 = vmul.f32 0.1, %v421_v48 }
 0x130   : > { %v425_v50 = vsel %vm423_vm3, %v421_v48, %v424_v49 }
 0x131   : > { %570 = vmatmul.f32.vlgmr.msrb.gmra.mxu0 %v425_v50  ;;  %590 = vmatmul.f32.vlgmr.msrb.gmra.mxu1 %v425_v50 }
 0x132   : > { %610 = vmatmul.f32.vlgmr.msrb.gmra.mxu2 %v425_v50  ;;  %630 = vmatmul.f32.vlgmr.msrb.gmra.mxu3 %v425_v50 }
 0x139   : > { %650 = vmatmul.f32.vlgmr.msra.gmra.mxu0 %v425_v50  ;;  %670 = vmatmul.f32.vlgmr.msra.gmra.mxu1 %v425_v50 }
 0x13a   : > { %690 = vmatmul.f32.vlgmr.msra.gmra.mxu2 %v425_v50 }
 0x1ae   : > { %v571_v54 = vpop.f32.mrf.mxu0  ;;  %v591_v55 = vpop.f32.mrf.mxu1 }
 0x1af   : > { %v572_v56 = vadd.f32 %v571_v54, %v540_v52  ;;  %v592_v57 = vadd.f32 %v591_v55, %v541_v53 }
 0x1b1   : > { %837 = vtanh.f32 %v572_v56 }
 0x1b2   : > { %839 = vtanh.f32 %v592_v57 }
 0x1b5   : > { %v611_v62 = vpop.f32.mrf.mxu2  ;;  %v631_v63 = vpop.f32.mrf.mxu3 }
 0x1b6   : > { %v612_v0 = vadd.f32 %v611_v62, %v542_v58  ;;  %v632_v1 = vadd.f32 %v631_v63, %v543_v59  ;;  %v651_v2 = vpop.f32.mrf.mxu0  ;;  %v671_v3 = vpop.f32.mrf.mxu1 }
 0x1b7   : > { %v838_v4 = vpop.eup %837  ;;  %v652_v5 = vadd.f32 %v651_v2, %v544_v60  ;;  %v672_v6 = vadd.f32 %v671_v3, %v545_v61 }
 0x1b8   : > { %v840_v7 = vpop.eup %839  ;;  %701 = vst [vmem:[%s269_s9] sm:$0xff] %v838_v4  ;;  %841 = vtanh.f32 %v612_v0 }
 0x1b9   : > { %702 = vst [vmem:[%s269_s9 + $0x8] sm:$0xff] %v840_v7  ;;  %843 = vtanh.f32 %v632_v1 }
 0x1ba   : > { %845 = vtanh.f32 %v652_v5 }
 0x1bb   : > { %847 = vtanh.f32 %v672_v6 }
 0x1bd   : > { %v691_v9 = vpop.f32.mrf.mxu2 }
 0x1be   : > { %v842_v10 = vpop.eup %841  ;;  %v692_v11 = vadd.f32 %v691_v9, %v546_v8 }
 0x1bf   : > { %v844_v12 = vpop.eup %843  ;;  %703 = vst [vmem:[%s269_s9 + $0x10] sm:$0xff] %v842_v10 }
 0x1c0   : > { %v846_v13 = vpop.eup %845  ;;  %704 = vst [vmem:[%s269_s9 + $0x18] sm:$0xff] %v844_v12  ;;  %849 = vtanh.f32 %v692_v11 }
 0x1c1   : > { %v848_v14 = vpop.eup %847  ;;  %705 = vst [vmem:[%s269_s9 + $0x20] sm:$0xff] %v846_v13 }
 0x1c2   : > { %706 = vst [vmem:[%s269_s9 + $0x28] sm:$0xff] %v848_v14 }
 0x1c6   : > { %v850_v15 = vpop.eup %849 }
 0x1c7   : > { %708 = vst.msk [vmem:[%s269_s9 + $0x30] sm:$0xff] %vm707_vm4, %v850_v15 }
 0x1c8   : > { %878 = shalt.err (!%p875_p3)
}
 0x1c9   : > { %797 = dma.vmem_to_hbm [thread:$0]  (%p993_p5), %s724_s17, 896, %s726_s18, %s710_s28  }
 0x1ca PF: > { %p803_p4 = scmp.ge.s32.totalorder %s913_s27, 2  ;;  %s737_s8 = sand.u32 1, %s901_s24  }
 0x1cb   : > { %s738_s9 = scalar_lea.sflag [#allocation3], %s737_s8 }
 0x1cc   : > { %p800_p7 = pnand %p803_p4, %p997_p6 }
 0x1ce   : > { %p801_p8 = pneg %p800_p7 }
 0x1d0   : > { %896 = dma.done.wait (%p801_p8), %s738_s9, 896  }
 0x1d1   : > { %898 = vsyncadd (%p801_p8), %s738_s9, 4294966400  ;;  %p17_p9 = scmp.ge.s32.totalorder %s980_s30, 4   ;;  %s1546_s24 = smov %s905_s25 }
 0x1d2   : > { %s1547_s25 = smov %s909_s26  ;;  %s1548_s26 = smov %s991_s10 }
 0x1d3   : > { %s1549_s27 = smov %s980_s30  ;;  %19 = sbr.rel (!%p17_p9) target bundleno = 3 (0x3), region = 83 }
 0x1d8   :  { %744 = vsyncpa [#allocation3], 1 }
 0x1d9   :  { %746 = vsyncpa [#allocation3 + $0x1], 1 }

</bundles_post_ra>
